<compile_context>
chip_gen: v7x
topology: tpu7x:2x2x1
jax: 0.10.0
libtpu: 0.0.40
codegen_flags: <defaults>
</compile_context>

<pallas_src>
import jax
import jax.numpy as jnp
from jax.experimental import pallas as pl
from jax.experimental.pallas import tpu as pltpu


def _im2col_matmul_bias_kernel(x_ref, w_ref, b_ref, o_ref):
    # x_ref: (TM, K)      im2col patch rows (K = 9*Cin)
    # w_ref: (K, Cout_p)  conv weights with BN scale folded in
    # b_ref: (1, Cout_p)  BN folded bias = beta - mean * gamma / sqrt(var+eps)
    # o_ref: (TM, Cout_p)
    acc = jnp.dot(x_ref[...], w_ref[...], preferred_element_type=jnp.float32)
    o_ref[...] = (acc + b_ref[...]).astype(o_ref.dtype)


def single_up_forward(x_nchw, weight_oihw, gamma, beta, running_mean,
                      running_var, eps=1e-5, tile_m=128,
                      compute_dtype=jnp.float32):
    """Forward of singleUp: Conv2d(3x3, pad=1, bias=False) + BatchNorm2d (eval).

    compute_dtype: jnp.bfloat16 can be used on v6e/v7x for halved DMA bytes
    (accumulation stays f32 via preferred_element_type); default f32.
    """
    N, Cin, H, W = x_nchw.shape
    Cout = weight_oihw.shape[0]
    K = 9 * Cin

    # ---- wrapper-side im2col (layout prep done once by XLA) ----
    x = jnp.transpose(x_nchw, (0, 2, 3, 1))                        # NHWC
    xp = jnp.pad(x, ((0, 0), (1, 1), (1, 1), (0, 0)))
    # Tap order (dy, dx, cin) — must match the weight reshape below.
    patches = jnp.concatenate(
        [xp[:, dy:dy + H, dx:dx + W, :] for dy in range(3) for dx in range(3)],
        axis=-1)                                                   # (N,H,W,9*Cin)
    patches = patches.reshape(N * H * W, K).astype(compute_dtype)

    # ---- fold eval-mode BN into weights / bias ----
    inv_std = (gamma / jnp.sqrt(running_var + eps)).astype(jnp.float32)
    bias = (beta - running_mean * inv_std).astype(jnp.float32)
    # OIHW -> (dy, dx, cin, cout) -> (9*Cin, Cout), per-Cout scale folded in.
    w2 = jnp.transpose(weight_oihw, (2, 3, 1, 0)).reshape(K, Cout)
    w2 = (w2.astype(jnp.float32) * inv_std[None, :]).astype(compute_dtype)

    # ---- pad M and Cout so every block is sublane/lane aligned (no masks) ----
    M = N * H * W
    Mp = pl.cdiv(M, tile_m) * tile_m
    Cp = pl.cdiv(Cout, 128) * 128
    if Mp != M:
        patches = jnp.pad(patches, ((0, Mp - M), (0, 0)))
    if Cp != Cout:
        w2 = jnp.pad(w2, ((0, 0), (0, Cp - Cout)))
        bias = jnp.pad(bias, (0, Cp - Cout))
    bias2 = bias.reshape(1, Cp)

    out = pl.pallas_call(
        _im2col_matmul_bias_kernel,
        out_shape=jax.ShapeDtypeStruct((Mp, Cp), jnp.float32),
        grid=(Mp // tile_m,),
        in_specs=[
            pl.BlockSpec((tile_m, K), lambda i: (i, 0)),   # patch row tile
            pl.BlockSpec((K, Cp), lambda i: (0, 0)),       # weights (resident)
            pl.BlockSpec((1, Cp), lambda i: (0, 0)),       # bias (resident)
        ],
        out_specs=pl.BlockSpec((tile_m, Cp), lambda i: (i, 0)),
        compiler_params=pltpu.CompilerParams(
            dimension_semantics=("parallel",)),
    )(patches, w2, bias2)

    out = out[:M, :Cout].reshape(N, H, W, Cout)
    return jnp.transpose(out, (0, 3, 1, 2))                        # NHWC -> NCHW


def reference_forward(x_nchw, weight_oihw, gamma, beta, running_mean,
                      running_var, eps=1e-5):
    """Pure-JAX reference (lax conv + eval-mode BN) for correctness check."""
    y = jax.lax.conv_general_dilated(
        x_nchw, weight_oihw,
        window_strides=(1, 1), padding=((1, 1), (1, 1)),
        dimension_numbers=("NCHW", "OIHW", "NCHW"),
    )
    inv_std = gamma / jnp.sqrt(running_var + eps)
    scale = inv_std.reshape(1, -1, 1, 1)
    bias = (beta - running_mean * inv_std).reshape(1, -1, 1, 1)
    return y * scale + bias


if __name__ == "__main__":
    # Small shapes consistent with the module:
    # in_plane=4, out_plane=128 (module default), batch=2, spatial=16x16.
    N, Cin, H, W = 2, 4, 16, 16
    Cout = 128

    key = jax.random.PRNGKey(0)
    kx, kw, kg, kb, km, kv = jax.random.split(key, 6)

    x = jax.random.normal(kx, (N, Cin, H, W), dtype=jnp.float32)
    # Conv2d(in_plane, out_plane, 3, padding=1, bias=False) -> weight (Cout, Cin, 3, 3)
    weight = 0.1 * jax.random.normal(kw, (Cout, Cin, 3, 3), dtype=jnp.float32)
    # BatchNorm2d(out_plane) parameters / running stats (deterministic).
    gamma = 1.0 + 0.05 * jax.random.normal(kg, (Cout,), dtype=jnp.float32)
    beta = 0.05 * jax.random.normal(kb, (Cout,), dtype=jnp.float32)
    running_mean = 0.1 * jax.random.normal(km, (Cout,), dtype=jnp.float32)
    running_var = 1.0 + 0.1 * jax.random.uniform(kv, (Cout,), dtype=jnp.float32)

    out = single_up_forward(x, weight, gamma, beta, running_mean, running_var)
    out = jax.block_until_ready(out)

    ref = reference_forward(x, weight, gamma, beta, running_mean, running_var)
    ref = jax.block_until_ready(ref)

    assert out.shape == (N, Cout, H, W), out.shape
    assert jnp.allclose(out, ref, atol=1e-4, rtol=1e-4), (
        float(jnp.max(jnp.abs(out - ref)))
    )

    print("KERNEL_OK")
</pallas_src>

<mosaic_0001>
module attributes {stable_mosaic.version = 11 : i64} {
  func.func @_im2col_matmul_bias_kernel(%arg0: i32, %arg1: memref<128x36xf32, #tpu.memory_space<vmem>>, %arg2: memref<36x128xf32, #tpu.memory_space<vmem>>, %arg3: memref<1x128xf32, #tpu.memory_space<vmem>>, %arg4: memref<128x128xf32, #tpu.memory_space<vmem>>) attributes {dimension_semantics = [#tpu.dimension_semantics<parallel>], iteration_bounds = array<i64: 4>, scalar_prefetch = 0 : i64, scratch_operands = 0 : i64, tpu.core_type = #tpu.core_type<tc>, window_params = [{transform_indices = @transform_0, window_bounds = array<i64: 128, 36>}, {pipeline_mode = #tpu.pipeline_mode<synchronous>, transform_indices = @transform_1, window_bounds = array<i64: 36, 128>}, {pipeline_mode = #tpu.pipeline_mode<synchronous>, transform_indices = @transform_2, window_bounds = array<i64: 1, 128>}, {transform_indices = @transform_3, window_bounds = array<i64: 128, 128>}]} {
    %c0 = arith.constant 0 : index
    %c0_0 = arith.constant 0 : index
    %0 = vector.load %arg1[%c0, %c0_0] : memref<128x36xf32, #tpu.memory_space<vmem>>, vector<128x36xf32>
    %c0_1 = arith.constant 0 : index
    %c0_2 = arith.constant 0 : index
    %1 = vector.load %arg2[%c0_1, %c0_2] : memref<36x128xf32, #tpu.memory_space<vmem>>, vector<36x128xf32>
    %cst = arith.constant dense<0.000000e+00> : vector<128x128xf32>
    %2 = tpu.matmul %0, %1, %cst {dimension_numbers = #tpu.dot_dimension_numbers<[1], [0], [0], [1], [0, 0, 1, 1], [], []>} : vector<128x36xf32>, vector<36x128xf32>, vector<128x128xf32> -> vector<128x128xf32>
    %c0_3 = arith.constant 0 : index
    %c0_4 = arith.constant 0 : index
    %3 = vector.load %arg3[%c0_3, %c0_4] : memref<1x128xf32, #tpu.memory_space<vmem>>, vector<1x128xf32>
    %4 = vector.broadcast %3 : vector<1x128xf32> to vector<128x128xf32>
    %5 = arith.addf %2, %4 : vector<128x128xf32>
    %c0_5 = arith.constant 0 : index
    %c0_6 = arith.constant 0 : index
    %6 = vector.load %arg4[%c0_5, %c0_6] : memref<128x128xf32, #tpu.memory_space<vmem>>, vector<128x128xf32>
    tpu.vector_store %arg4[%c0_5, %c0_6], %5 {strides = array<i32>} : memref<128x128xf32, #tpu.memory_space<vmem>>, vector<128x128xf32>,
    return
  }
  func.func @transform_0(%arg0: i32) -> (i32, i32) {
    %c0_i32 = arith.constant 0 : i32
    %c0_i32_0 = arith.constant 0 : i32
    return %arg0, %c0_i32 : i32, i32
  }
  func.func @transform_1(%arg0: i32) -> (i32, i32) {
    %c0_i32 = arith.constant 0 : i32
    %c0_i32_0 = arith.constant 0 : i32
    %c0_i32_1 = arith.constant 0 : i32
    return %c0_i32, %c0_i32_0 : i32, i32
  }
  func.func @transform_2(%arg0: i32) -> (i32, i32) {
    %c0_i32 = arith.constant 0 : i32
    %c0_i32_0 = arith.constant 0 : i32
    %c0_i32_1 = arith.constant 0 : i32
    return %c0_i32, %c0_i32_0 : i32, i32
  }
  func.func @transform_3(%arg0: i32) -> (i32, i32) {
    %c0_i32 = arith.constant 0 : i32
    %c0_i32_0 = arith.constant 0 : i32
    return %arg0, %c0_i32 : i32, i32
  }
}

</mosaic_0001>

<bundles_post_ra>
// kernel: tpu_custom_call.1
= control target key start
LH: loop header
LB: loop body
LE: loop exit
PB: predicated region body
PF: predicated region fallthrough
CT: control target
= control target key end

     0   :  { %8 = vsyncpa [#allocation3], 0  ;;  %s899_s0 = inlined_call_operand.vmem [shape: f32[512,36], index: 0, kind: input, shape index: {}]   ;;  %s900_s1 = inlined_call_operand.vmem [shape: f32[36,128], index: 1, kind: input, shape index: {}]   ;;  %s901_s2 = inlined_call_operand.vmem [shape: f32[1,128], index: 2, kind: input, shape index: {}]   ;;  %s902_s3 = inlined_call_operand.hbm [shape: f32[512,128], index: 3, kind: output, shape index: {}]  }
   0x1   :  { %10 = vsyncpa [#allocation3 + $0x1], 0  ;;  %s718_s12 = smov 0   ;;  %s720_s13 = smov 0  }
   0x2   :  { %s722_s14 = smov 0   ;;  %s724_s15 = smov 0  }
   0x3 LB: > { %s739_s16 = sadd.s32 4294967295, %s693_s15   ;;  %s490_s17 = sadd.s32 4294967294, %s693_s15   ;;  %s693_s15 = sphi %s724_s15, %s908_s15   ;;  %s689_s14 = sphi %s722_s14, %s907_s14   ;;  %s685_s13 = sphi %s720_s13, %s906_s13   ;;  %s681_s12 = sphi %s718_s12, %s905_s12  }
   0x4   : > { %s743_s18 = sadd.s32 1, %s693_s15   ;;  %s91_s19 = sadd.s32 1, %s689_s14 }
   0x5   : > { %s88_s20 = ssub.s32 %s693_s15, %s743_s18  ;;  %p101_p0 = scmp.ne.s32.totalorder %s689_s14, %s685_s13 }
   0x6   : > { %p89_p1 = scmp.eq.s32.totalorder %s88_s20, 0  ;;  %p102_p2 = scmp.eq.s32.totalorder %s739_s16, 3 }
   0x7   : > { %p107_p3 = scmp.ne.s32.totalorder %s685_s13, %s681_s12  ;;  %p108_p4 = scmp.eq.s32.totalorder %s490_s17, 3 }
   0x8   : > { %s754_s21 = scalar_select %p89_p1, %s689_s14, %s91_s19  }
   0x9   : > { %p756_p5 = por %p102_p2, %p101_p0  ;;  %p760_p6 = por %p108_p4, %p107_p3 }
   0xa   : > { %p493_p7 = scmp.ge.s32.totalorder %s693_s15, 1  ;;  %p141_p8 = scmp.lt.s32.totalorder %s693_s15, 5 }
   0xc   : > { %p142_p9 = pnand %p493_p7, %p141_p8 }
   0xd   : > { %v188_v0 = vld [vmem:[%s900_s1] sm:$0xff] (!%p142_p9)  ;;  %v189_v1 = vld [vmem:[%s900_s1 + $0x8] sm:$0xff] (!%p142_p9)  ;;  %v190_v2 = vld [vmem:[%s900_s1 + $0x10] sm:$0xff] (!%p142_p9)  ;;  %s495_s30 = sshll.u32 (!%p142_p9), %s739_s16, 4  ;;  %vm249_vm0 = vcmask (!%p142_p9), 1043456   ;;  %vm200_vm1 = vcmask (!%p142_p9), 293888  }
   0xe   : > { %145 = sbr.rel (%p142_p9) target bundleno = 269 (0x10d), region = 32  ;;  %v576_v3 = vpack.c.bf16 (!%p142_p9), %v189_v1, %v188_v0  ;;  %v191_v4 = vld [vmem:[%s900_s1 + $0x18] sm:$0xff] (!%p142_p9)  ;;  %p166_p10 = scmp.lt.s32.totalorder (!%p142_p9), %s495_s30, 63  ;;  %v192_v6 = vld [vmem:[%s900_s1 + $0x20] sm:$0xf] (!%p142_p9) }
   0xf   : > { %v580_v5 = vpack.c.bf16 (!%p142_p9), %v191_v4, %v190_v2  ;;  %s162_s17 = sand.u32 (!%p142_p9), 1, %s685_s13   ;;  %v497_v23 = vld [vmem:[%s901_s2] ss:$0 sm:$0xff] (!%p142_p9)  ;;  %s520_s26 = sshll.u32 (!%p142_p9), %s739_s16, 11 }
  0x10   : > { %577 = vmatprep.subr.bf16.mxu0 (!%p142_p9), %v576_v3  ;;  %584 = vmatprep.subr.bf16.mxu1 (!%p142_p9), %v576_v3  ;;  %s494_s19 = sshll.u32 (!%p142_p9), %s162_s17, 7  ;;  %s848_s16 = scalar_lea.hbm (!%p142_p9), %s902_s3, %s520_s26 }
  0x11   : > { %579 = vmatpush3.bf16.msra.mxu0 (!%p142_p9), %v576_v3  ;;  %587 = vmatpush3.bf16.msra.mxu1 (!%p142_p9), %v576_v3  ;;  %s829_s25 = scalar_lea.vmem (!%p142_p9), [#allocation2], %s494_s19  ;;  %s695_s5 = smov (!%p142_p9), [#allocation2]  }
  0x12   : > { %581 = vmatprep.subr.bf16.mxu0 (!%p142_p9), %v580_v5  ;;  %585 = vmatprep.subr.bf16.mxu1 (!%p142_p9), %v580_v5  ;;  %s428_s27 = sshll.u32 (!%p142_p9), %s829_s25, 4  ;;  %s850_s27 = int_to_ptr.vmem [resolvable:$true] %s428_s27 }
  0x13   : > { %s631_s4 = scalar_lea.vmem (!%p142_p9), %s850_s27, 2048 }
  0x14   : > { %p632_p11 = scmp.ne.s32.totalorder (!%p142_p9), %s850_s27, %s631_s4 }
  0x15   : > { %s910_s30 = smov (!%p166_p10, %s495_s30), 63  ;;  %583 = vmatpush3.bf16.msra.mxu0 %v580_v5  ;;  %588 = vmatpush3.bf16.msra.mxu1 %v580_v5 }
  0x16   : > { %s496_s6 = sshll.u32 %s910_s30, 3  ;;  %550 = vmatprep.subr.msk.mxu0 %vm249_vm0, %v192_v6  ;;  %586 = vmatprep.subr.msk.mxu1 %vm249_vm0, %v192_v6  ;;  %s858_s30 = scalar_lea.sflag [#allocation3], %s162_s17 }
  0x17   : > { %s785_s11 = scalar_lea.vmem %s899_s0, %s496_s6  ;;  %p633_p12 = pnand %p632_p11, %p756_p5 }
  0x18   : > { %v172_v7 = vld [vmem:[%s785_s11] sm:$0xff]  ;;  %v173_v9 = vld [vmem:[%s785_s11 + $0x8] sm:$0xff]  ;;  %v174_v11 = vld [vmem:[%s785_s11 + $0x10] sm:$0xff]  ;;  %s635_s6 = sshll.u32 %s695_s5, 4  ;;  %s636_s6 = int_to_ptr.vmem [resolvable:$false] %s635_s6 }
  0x19   : > { %v180_v8 = vld [vmem:[%s785_s11 + $0x40] sm:$0xff]  ;;  %552 = vmatprep.mubr.msk.f32.mxu0 %vm200_vm1, %v172_v7  ;;  %v181_v10 = vld [vmem:[%s785_s11 + $0x48] sm:$0xff]  ;;  %v182_v12 = vld [vmem:[%s785_s11 + $0x50] sm:$0xff]  ;;  %551 = vmatpush3.msk.msra.mxu0 %vm249_vm0, %v192_v6  ;;  %p634_p13 = pneg %p633_p12  ;;  %s637_s7 = scalar_lea.vmem %s636_s6, 4096 }
  0x1a   : > { %564 = vmatprep.mubr.msk.f32.mxu1 %vm200_vm1, %v180_v8  ;;  %589 = vmatpush3.msk.msra.mxu1 %vm249_vm0, %v192_v6  ;;  %v175_v13 = vld [vmem:[%s785_s11 + $0x18] sm:$0xff]  ;;  %v176_v15 = vld [vmem:[%s785_s11 + $0x20] sm:$0xff]  ;;  %v177_v17 = vld [vmem:[%s785_s11 + $0x28] sm:$0xff]  ;;  %p638_p0 = scmp.lt.s32.totalorder %s850_s27, %s636_s6  ;;  %p639_p1 = scmp.lt.s32.totalorder %s637_s7, %s631_s4 }
  0x1b   : > { %553 = vmatmul.mubr.msk.f32.vlgmr.msra.gmra.mrb[0].mxu0 %vm200_vm1, %v173_v9  ;;  %565 = vmatmul.mubr.msk.f32.vlgmr.msra.gmra.mrb[0].mxu1 %vm200_vm1, %v181_v10  ;;  %v183_v14 = vld [vmem:[%s785_s11 + $0x58] sm:$0xff]  ;;  %v184_v16 = vld [vmem:[%s785_s11 + $0x60] sm:$0xff]  ;;  %v185_v18 = vld [vmem:[%s785_s11 + $0x68] sm:$0xff] }
  0x1c   : > { %555 = vmatprep.mubr.msk.f32.mxu0 %vm200_vm1, %v174_v11  ;;  %567 = vmatprep.mubr.msk.f32.mxu1 %vm200_vm1, %v182_v12  ;;  %v178_v19 = vld [vmem:[%s785_s11 + $0x30] sm:$0xff]  ;;  %v179_v21 = vld [vmem:[%s785_s11 + $0x38] sm:$0xff]  ;;  %p640_p2 = por %p639_p1, %p638_p0 }
  0x1d   : > { %v186_v20 = vld [vmem:[%s785_s11 + $0x70] sm:$0xff]  ;;  %v187_v22 = vld [vmem:[%s785_s11 + $0x78] sm:$0xff] }
  0x1e   : > { %p641_p3 = pnand %p640_p2, %p634_p13 }
  0x1f   : > { %556 = vmatmul.mubr.msk.f32.gmra.mrb[2].mxu0 %vm200_vm1, %v175_v13  ;;  %568 = vmatmul.mubr.msk.f32.gmra.mrb[2].mxu1 %vm200_vm1, %v183_v14 }
  0x20   : > { %558 = vmatprep.mubr.msk.f32.mxu0 %vm200_vm1, %v176_v15  ;;  %570 = vmatprep.mubr.msk.f32.mxu1 %vm200_vm1, %v184_v16 }
  0x23   : > { %559 = vmatmul.mubr.msk.f32.gmra.mrb[4].mxu0 %vm200_vm1, %v177_v17  ;;  %571 = vmatmul.mubr.msk.f32.gmra.mrb[4].mxu1 %vm200_vm1, %v185_v18 }
  0x24   : > { %561 = vmatprep.mubr.msk.f32.mxu0 %vm200_vm1, %v178_v19  ;;  %573 = vmatprep.mubr.msk.f32.mxu1 %vm200_vm1, %v186_v20 }
  0x27   : > { %562 = vmatmul.mubr.msk.f32.gmra.mrb[6].mxu0 %vm200_vm1, %v179_v21  ;;  %574 = vmatmul.mubr.msk.f32.gmra.mrb[6].mxu1 %vm200_vm1, %v187_v22 }
  0xee   : > { %v554_v24 = vpop.f32.mrb[0].mxu0  ;;  %v566_v25 = vpop.f32.mrb[0].mxu1 }
  0xef   : > { %v325_v26 = vadd.f32 %v554_v24, %v497_v23  ;;  %v365_v27 = vadd.f32 %v566_v25, %v497_v23  ;;  %v319_v28 = vpop.f32.mrb[1].mxu0  ;;  %v359_v29 = vpop.f32.mrb[1].mxu1 }
  0xf0   : > { %v320_v30 = vadd.f32 %v497_v23, %v319_v28  ;;  %v360_v31 = vadd.f32 %v497_v23, %v359_v29 }
  0xf1   : > { %399 = vst [vmem:[%s829_s25 + $0x8] sm:$0xff] %v325_v26  ;;  %407 = vst [vmem:[%s829_s25 + $0x48] sm:$0xff] %v365_v27 }
  0xf2   : > { %398 = vst [vmem:[%s829_s25] sm:$0xff] %v320_v30  ;;  %406 = vst [vmem:[%s829_s25 + $0x40] sm:$0xff] %v360_v31  ;;  %v557_v32 = vpop.f32.mrb[2].mxu0  ;;  %v569_v33 = vpop.f32.mrb[2].mxu1 }
  0xf3   : > { %v335_v34 = vadd.f32 %v557_v32, %v497_v23  ;;  %v375_v35 = vadd.f32 %v569_v33, %v497_v23  ;;  %v329_v36 = vpop.f32.mrb[3].mxu0  ;;  %v369_v37 = vpop.f32.mrb[3].mxu1 }
  0xf4   : > { %v330_v38 = vadd.f32 %v497_v23, %v329_v36  ;;  %v370_v39 = vadd.f32 %v497_v23, %v369_v37 }
  0xf5   : > { %401 = vst [vmem:[%s829_s25 + $0x18] sm:$0xff] %v335_v34  ;;  %409 = vst [vmem:[%s829_s25 + $0x58] sm:$0xff] %v375_v35 }
  0xf6   : > { %400 = vst [vmem:[%s829_s25 + $0x10] sm:$0xff] %v330_v38  ;;  %408 = vst [vmem:[%s829_s25 + $0x50] sm:$0xff] %v370_v39  ;;  %v560_v40 = vpop.f32.mrb[4].mxu0  ;;  %v572_v41 = vpop.f32.mrb[4].mxu1 }
  0xf7   : > { %v345_v42 = vadd.f32 %v560_v40, %v497_v23  ;;  %v385_v43 = vadd.f32 %v572_v41, %v497_v23  ;;  %v339_v44 = vpop.f32.mrb[5].mxu0  ;;  %v379_v45 = vpop.f32.mrb[5].mxu1 }
  0xf8   : > { %v340_v46 = vadd.f32 %v497_v23, %v339_v44  ;;  %v380_v47 = vadd.f32 %v497_v23, %v379_v45 }
  0xf9   : > { %403 = vst [vmem:[%s829_s25 + $0x28] sm:$0xff] %v345_v42  ;;  %411 = vst [vmem:[%s829_s25 + $0x68] sm:$0xff] %v385_v43 }
  0xfa   : > { %402 = vst [vmem:[%s829_s25 + $0x20] sm:$0xff] %v340_v46  ;;  %410 = vst [vmem:[%s829_s25 + $0x60] sm:$0xff] %v380_v47  ;;  %v563_v48 = vpop.f32.mrb[6].mxu0  ;;  %v575_v49 = vpop.f32.mrb[6].mxu1 }
  0xfb   : > { %v355_v50 = vadd.f32 %v563_v48, %v497_v23  ;;  %v395_v51 = vadd.f32 %v575_v49, %v497_v23  ;;  %v349_v52 = vpop.f32.mrb[7].mxu0  ;;  %v389_v53 = vpop.f32.mrb[7].mxu1 }
  0xfc   : > { %v350_v54 = vadd.f32 %v497_v23, %v349_v52  ;;  %v390_v55 = vadd.f32 %v497_v23, %v389_v53 }
  0xfd   : > { %405 = vst [vmem:[%s829_s25 + $0x38] sm:$0xff] %v355_v50  ;;  %413 = vst [vmem:[%s829_s25 + $0x78] sm:$0xff] %v395_v51 }
  0xfe   : > { %404 = vst [vmem:[%s829_s25 + $0x30] sm:$0xff] %v350_v54  ;;  %412 = vst [vmem:[%s829_s25 + $0x70] sm:$0xff] %v390_v55 }
  0xff   : > { %644 = shalt.err (!%p641_p3)
}
 0x100   : > { %s645_s8 = scalar_lea.hbm %s848_s16, 2048  ;;  %s649_s11 = scalar_lea.hbm %s902_s3, 8192 }
 0x101   : > { %p646_p4 = scmp.ne.s32.totalorder %s848_s16, %s645_s8  ;;  %p650_p9 = scmp.lt.u32.totalorder %s848_s16, %s902_s3 }
 0x102   : > { %p651_p10 = scmp.lt.u32.totalorder %s649_s11, %s645_s8  ;;  %p653_p12 = scmp.lt.u32.totalorder %s645_s8, %s848_s16 }
 0x103   : > { %p647_p7 = pnand %p646_p4, %p756_p5 }
 0x104   : > { %p652_p11 = por %p651_p10, %p650_p9 }
 0x105   : > { %p648_p8 = pneg %p647_p7 }
 0x106   : > { %p654_p13 = por %p653_p12, %p652_p11 }
 0x108   : > { %p655_p0 = pnand %p654_p13, %p648_p8 }
 0x10a   : > { %658 = shalt.err (!%p655_p0)
}
 0x10b   : > { %s696_s20 = smov 128   ;;  %s697_s24 = smov 8  }
 0x10c   : > { %590 = dma.vmem_to_hbm [thread:$0]  (%p756_p5), %s850_s27, 2048, %s848_s16, %s858_s30, %s696_s20, %s696_s20, %s697_s24  }
 0x10d PF: > { %p596_p1 = scmp.ge.s32.totalorder %s693_s15, 2  ;;  %s443_s25 = sand.u32 1, %s681_s12  }
 0x10e   : > { %s444_s26 = scalar_lea.sflag [#allocation3], %s443_s25 }
 0x10f   : > { %p593_p2 = pnand %p596_p1, %p760_p6 }
 0x111   : > { %676 = dma.done.wait (!%p593_p2), %s444_s26, 2048  }
 0x112   : > { %678 = vsyncadd (!%p593_p2), %s444_s26, 4294965248  ;;  %p13_p3 = scmp.ge.s32.totalorder %s743_s18, 6   ;;  %s905_s12 = smov %s685_s13 }
 0x113   : > { %s906_s13 = smov %s689_s14  ;;  %s907_s14 = smov %s754_s21 }
 0x114   : > { %s908_s15 = smov %s743_s18  ;;  %15 = sbr.rel (!%p13_p3) target bundleno = 3 (0x3), region = 67 }
 0x11b   :  { %449 = vsyncpa [#allocation3], 1 }
 0x11c   :  { %451 = vsyncpa [#allocation3 + $0x1], 1 }

</bundles_post_ra>
